<compile_context>
chip_gen: v7x
topology: tpu7x:2x2x1
jax: 0.10.0
libtpu: 0.0.40
codegen_flags: <defaults>
</compile_context>

<pallas_src>
import functools

import jax
import jax.numpy as jnp
from jax.experimental import pallas as pl
from jax.experimental.pallas import tpu as pltpu


def _mse_kernel(x_ref, y_ref, out_ref, acc_ref, *, inv_n, rows, tm, need_mask):
    """Accumulate (x-y)^2 into a tile-shaped VMEM accumulator; finalize once."""
    i = pl.program_id(0)

    @pl.when(i == 0)
    def _():
        acc_ref[...] = jnp.zeros_like(acc_ref)

    d = x_ref[...].astype(jnp.float32) - y_ref[...].astype(jnp.float32)
    if need_mask:
        # Last row-tile may extend past `rows`; out-of-bounds data is
        # undefined, so zero its contribution.
        row = jax.lax.broadcasted_iota(jnp.int32, d.shape, 0) + i * tm
        d = jnp.where(row < rows, d, jnp.float32(0.0))
    acc_ref[...] += d * d

    @pl.when(i == pl.num_programs(0) - 1)
    def _():
        out_ref[0, 0] = jnp.sum(acc_ref[...]) * jnp.float32(inv_n)


def mse_loss_pallas(outputs, targets, *, target_tile_elems=256 * 1024,
                    lane_candidates=(1024, 512, 256, 128)):
    """mean((outputs - targets)**2) computed with a Pallas TPU kernel."""
    assert outputs.shape == targets.shape, "MSELoss requires matching shapes"
    total_n = outputs.size

    # Flatten to 1-D (free for contiguous arrays) and pick a lane-dense width.
    x = outputs.reshape(-1)
    y = targets.reshape(-1)

    lane = None
    for cand in lane_candidates:
        if total_n % cand == 0:
            lane = cand
            break
    if lane is None:
        # Fallback: pad only the flat tail (< LANE zeros, contribute 0 to sum).
        lane = lane_candidates[0]
        pad = (-total_n) % lane
        x = jnp.pad(x, (0, pad))
        y = jnp.pad(y, (0, pad))

    rows = x.size // lane
    x2 = x.reshape(rows, lane)
    y2 = y.reshape(rows, lane)

    # ~1 MiB f32 per input per grid step; row-tile multiple of 8 sublanes.
    tm = max(8, (target_tile_elems // lane // 8) * 8)
    if tm >= rows:
        tm = rows          # single block over full row extent (always legal)
        need_mask = False
    else:
        need_mask = (rows % tm) != 0
    grid = (pl.cdiv(rows, tm),)

    kernel = functools.partial(
        _mse_kernel,
        inv_n=1.0 / float(total_n),
        rows=rows,
        tm=tm,
        need_mask=need_mask,
    )

    out = pl.pallas_call(
        kernel,
        out_shape=jax.ShapeDtypeStruct((1, 1), jnp.float32),
        grid_spec=pltpu.PrefetchScalarGridSpec(
            num_scalar_prefetch=0,
            grid=grid,
            in_specs=[
                pl.BlockSpec((tm, lane), lambda i: (i, 0)),
                pl.BlockSpec((tm, lane), lambda i: (i, 0)),
            ],
            out_specs=pl.BlockSpec(
                (1, 1), lambda i: (0, 0), memory_space=pltpu.SMEM
            ),
            scratch_shapes=[pltpu.VMEM((tm, lane), jnp.float32)],
        ),
        compiler_params=pltpu.CompilerParams(
            dimension_semantics=("arbitrary",),
            vmem_limit_bytes=32 * 1024 * 1024,
        ),
    )(x2, y2)

    return out[0, 0]


def loss_wrapper_forward(outputs, targets):
    """Mirror of LossWrapper.forward: returns {'l1_loss': mse, 'loss': mse}."""
    l1_loss = mse_loss_pallas(outputs, targets)
    return {"l1_loss": l1_loss, "loss": l1_loss}


if __name__ == "__main__":
    key = jax.random.PRNGKey(0)
    k1, k2 = jax.random.split(key)

    # Small NCHW-like shapes consistent with a typical image-model loss.
    shape = (2, 4, 16, 16)  # [B, C, H, W]
    outputs = jax.random.normal(k1, shape, dtype=jnp.float32)
    targets = jax.random.normal(k2, shape, dtype=jnp.float32)

    result = loss_wrapper_forward(outputs, targets)
    jax.block_until_ready(result)

    # Cross-check against plain-JAX reference.
    ref = jnp.mean((outputs - targets) ** 2)
    assert jnp.allclose(result["loss"], ref, rtol=1e-5, atol=1e-6), (
        result["loss"], ref)
    assert jnp.allclose(result["l1_loss"], result["loss"])

    print("KERNEL_OK")
</pallas_src>

<mosaic_0001>
module attributes {stable_mosaic.version = 11 : i64} {
  func.func @_mse_kernel(%arg0: i32, %arg1: memref<2x1024xf32, #tpu.memory_space<vmem>>, %arg2: memref<2x1024xf32, #tpu.memory_space<vmem>>, %arg3: memref<1x1xf32, #tpu.memory_space<smem>>, %arg4: memref<2x1024xf32, #tpu.memory_space<vmem>>) attributes {dimension_semantics = [#tpu.dimension_semantics<arbitrary>], iteration_bounds = array<i64: 1>, scalar_prefetch = 0 : i64, scratch_operands = 1 : i64, tpu.core_type = #tpu.core_type<tc>, window_params = [{transform_indices = @transform_0, window_bounds = array<i64: 2, 1024>}, {transform_indices = @transform_1, window_bounds = array<i64: 2, 1024>}, {transform_indices = @transform_2, window_bounds = array<i64: 1, 1>}]} {
    %c0_i32 = arith.constant 0 : i32
    %0 = arith.cmpi eq, %arg0, %c0_i32 : i32
    %1 = arith.extui %0 : i1 to i32
    %c0_i32_0 = arith.constant 0 : i32
    %2 = arith.cmpi ne, %1, %c0_i32_0 : i32
    scf.if %2 {
      %cst = arith.constant 0.000000e+00 : f32
      %13 = vector.broadcast %cst : f32 to vector<2x1024xf32>
      %c0_10 = arith.constant 0 : index
      %c0_11 = arith.constant 0 : index
      %14 = vector.load %arg4[%c0_10, %c0_11] : memref<2x1024xf32, #tpu.memory_space<vmem>>, vector<2x1024xf32>
      tpu.vector_store %arg4[%c0_10, %c0_11], %13 {strides = array<i32>} : memref<2x1024xf32, #tpu.memory_space<vmem>>, vector<2x1024xf32>,
    } else {
    }
    %c0 = arith.constant 0 : index
    %c0_1 = arith.constant 0 : index
    %3 = vector.load %arg1[%c0, %c0_1] : memref<2x1024xf32, #tpu.memory_space<vmem>>, vector<2x1024xf32>
    %c0_2 = arith.constant 0 : index
    %c0_3 = arith.constant 0 : index
    %4 = vector.load %arg2[%c0_2, %c0_3] : memref<2x1024xf32, #tpu.memory_space<vmem>>, vector<2x1024xf32>
    %5 = arith.subf %3, %4 : vector<2x1024xf32>
    %c0_4 = arith.constant 0 : index
    %c0_5 = arith.constant 0 : index
    %6 = vector.load %arg4[%c0_4, %c0_5] : memref<2x1024xf32, #tpu.memory_space<vmem>>, vector<2x1024xf32>
    %7 = arith.mulf %5, %5 : vector<2x1024xf32>
    %8 = arith.addf %6, %7 : vector<2x1024xf32>
    %c0_6 = arith.constant 0 : index
    %c0_7 = arith.constant 0 : index
    %9 = vector.load %arg4[%c0_6, %c0_7] : memref<2x1024xf32, #tpu.memory_space<vmem>>, vector<2x1024xf32>
    tpu.vector_store %arg4[%c0_6, %c0_7], %8 {strides = array<i32>} : memref<2x1024xf32, #tpu.memory_space<vmem>>, vector<2x1024xf32>,
    %c0_i32_8 = arith.constant 0 : i32
    %10 = arith.cmpi eq, %arg0, %c0_i32_8 : i32
    %11 = arith.extui %10 : i1 to i32
    %c0_i32_9 = arith.constant 0 : i32
    %12 = arith.cmpi ne, %11, %c0_i32_9 : i32
    scf.if %12 {
      %c0_10 = arith.constant 0 : index
      %c0_11 = arith.constant 0 : index
      %13 = vector.load %arg4[%c0_10, %c0_11] : memref<2x1024xf32, #tpu.memory_space<vmem>>, vector<2x1024xf32>
      %14 = vector.shape_cast %13 : vector<2x1024xf32> to vector<1x2x1024xf32>
      %cst = arith.constant dense<0.000000e+00> : vector<1xf32>
      %15 = vector.multi_reduction <add>, %14, %cst [1, 2] : vector<1x2x1024xf32> to vector<1xf32>
      %16 = vector.shape_cast %15 : vector<1xf32> to vector<1x1x1xf32>
      %17 = vector.extract %16[0, 0, 0] : f32 from vector<1x1x1xf32>
      %cst_12 = arith.constant 4.8828125E-4 : f32
      %18 = arith.mulf %17, %cst_12 : f32
      %c0_13 = arith.constant 0 : index
      %c0_14 = arith.constant 0 : index
      %19 = memref.load %arg3[%c0_13, %c0_14] : memref<1x1xf32, #tpu.memory_space<smem>>
      memref.store %18, %arg3[%c0_13, %c0_14] : memref<1x1xf32, #tpu.memory_space<smem>>
    } else {
    }
    return
  }
  func.func @transform_0(%arg0: i32) -> (i32, i32) {
    %c0_i32 = arith.constant 0 : i32
    %c0_i32_0 = arith.constant 0 : i32
    return %arg0, %c0_i32 : i32, i32
  }
  func.func @transform_1(%arg0: i32) -> (i32, i32) {
    %c0_i32 = arith.constant 0 : i32
    %c0_i32_0 = arith.constant 0 : i32
    return %arg0, %c0_i32 : i32, i32
  }
  func.func @transform_2(%arg0: i32) -> (i32, i32) {
    %c0_i32 = arith.constant 0 : i32
    %c0_i32_0 = arith.constant 0 : i32
    %c0_i32_1 = arith.constant 0 : i32
    return %c0_i32, %c0_i32_0 : i32, i32
  }
}

</mosaic_0001>

<bundles_post_ra>
// kernel: tpu_custom_call.1
= control target key start
LH: loop header
LB: loop body
LE: loop exit
PB: predicated region body
PF: predicated region fallthrough
CT: control target
= control target key end

     0   :  { %7 = vsyncpa [#allocation4], 0  ;;  %s277_s0 = inlined_call_operand.hbm [shape: f32[2,1024], index: 0, kind: input, shape index: {}]   ;;  %s278_s1 = inlined_call_operand.hbm [shape: f32[2,1024], index: 1, kind: input, shape index: {}]   ;;  %s279_s2 = inlined_call_operand.hbm [shape: f32[1,1], index: 2, kind: output, shape index: {}]  }
   0x1   :  { %8 = vsyncpa [#allocation7], 0 }
   0x2   :  { %9 = vsyncpa [#allocation5], 0  ;;  %s214_s9 = smov [#allocation3]   ;;  %s215_s11 = smov [#allocation6]  }
   0x3   :  { %s16_s10 = sshll.u32 %s214_s9, 4  ;;  %s26_s12 = sshll.u32 %s215_s11, 4  ;;  %s17_s10 = int_to_ptr.vmem [resolvable:$true] %s16_s10  ;;  %s27_s12 = int_to_ptr.vmem [resolvable:$true] %s26_s12 }
   0x4   :  { %s154_s15 = scalar_lea.hbm %s277_s0, 256 }
   0x5   :  { %p155_p0 = scmp.ne.s32.totalorder %s277_s0, %s154_s15  ;;  %p158_p1 = scmp.lt.u32.totalorder %s154_s15, %s277_s0 }
   0x7   :  { %p160_p2 = pnand %p158_p1, %p155_p0 }
   0x9   :  { %163 = shalt.err (!%p160_p2)
}
   0xa   :  { %s164_s20 = scalar_lea.vmem %s17_s10, 256  ;;  %p169_p4 = scmp.lt.s32.totalorder %s17_s10, %s17_s10 }
   0xb   :  { %p165_p3 = scmp.ne.s32.totalorder %s17_s10, %s164_s20  ;;  %p170_p5 = scmp.lt.s32.totalorder %s164_s20, %s164_s20 }
   0xd   :  { %p171_p6 = por %p170_p5, %p169_p4 }
   0xf   :  { %p172_p7 = pnand %p171_p6, %p165_p3 }
  0x11   :  { %175 = shalt.err (!%p172_p7)
}
  0x12   :  { %19 = dma.hbm_to_vmem [thread:$0]  %s277_s0, 256, %s17_s10, [#allocation4]  }
  0x13   :  { %s176_s25 = scalar_lea.hbm %s278_s1, 256 }
  0x14   :  { %p177_p8 = scmp.ne.s32.totalorder %s278_s1, %s176_s25  ;;  %p180_p9 = scmp.lt.u32.totalorder %s176_s25, %s278_s1 }
  0x16   :  { %p182_p10 = pnand %p180_p9, %p177_p8 }
  0x18   :  { %185 = shalt.err (!%p182_p10)
}
  0x19   :  { %s186_s30 = scalar_lea.vmem %s27_s12, 256  ;;  %p191_p12 = scmp.lt.s32.totalorder %s27_s12, %s27_s12 }
  0x1a   :  { %p187_p11 = scmp.ne.s32.totalorder %s27_s12, %s186_s30  ;;  %p192_p13 = scmp.lt.s32.totalorder %s186_s30, %s186_s30 }
  0x1c   :  { %p193_p0 = por %p192_p13, %p191_p12 }
  0x1e   :  { %p194_p1 = pnand %p193_p0, %p187_p11 }
  0x20   :  { %197 = shalt.err (!%p194_p1)
}
  0x21   :  { %29 = dma.hbm_to_vmem [thread:$0]  %s278_s1, 256, %s27_s12, [#allocation7]  }
  0x22   :  { %208 = dma.done.wait [#allocation4], 256  }
  0x23   :  { %209 = vsyncadd [#allocation4], 4294967040 }
  0x24   :  { %210 = dma.done.wait [#allocation7], 256  }
  0x25   :  { %211 = vsyncadd [#allocation7], 4294967040  ;;  %v67_v0 = vlaneseq  ;;  %v216_v1 = vmov 1983009808   ;;  %v42_v5 = vld [vmem:[#allocation3] sm:$0xff]  ;;  %v43_v6 = vld [vmem:[#allocation3 + $0x8] sm:$0xff] }
  0x26   :  { %v65_v2 = vunpack.c.l.s4 %v216_v1  ;;  %v44_v7 = vld [vmem:[#allocation6] sm:$0xff]  ;;  %v45_v8 = vld [vmem:[#allocation6 + $0x8] sm:$0xff]  ;;  %vm105_vm0 = vcmask 1041408   ;;  %s198_s7 = scalar_lea.hbm %s279_s2, 16 }
  0x27   :  { %v68_v4 = vshrl.u32 %v67_v0, 7  ;;  %v46_v9 = vsub.f32 %v42_v5, %v44_v7  ;;  %v47_v11 = vsub.f32 %v43_v6, %v45_v8  ;;  %p199_p2 = scmp.ne.s32.totalorder %s279_s2, %s198_s7  ;;  %p202_p3 = scmp.lt.u32.totalorder %s198_s7, %s279_s2 }
  0x28   :  { %v66_v3 = vunpack.c.0.s8 %v65_v2 }
  0x29   :  { %v50_v12 = vmul.f32 %v46_v9, %v46_v9  ;;  %v51_v13 = vmul.f32 %v47_v11, %v47_v11  ;;  %p204_p4 = pnand %p202_p3, %p199_p2 }
  0x2a   :  { %v69_v10 = vsub.s32 %v66_v3, %v68_v4 }
  0x2b   :  { %v63_v14 = vcombine.high %v50_v12, %v50_v12  ;;  %v80_v16 = vcombine.high %v51_v13, %v51_v13 }
  0x2c   :  { %v70_v15 = vrot.slane %v50_v12, %v69_v10  ;;  %v87_v19 = vrot.slane %v51_v13, %v69_v10 }
  0x2d   :  { %v77_v17 = vrot.slane %v63_v14, %v69_v10  ;;  %v94_v25 = vrot.slane %v80_v16, %v69_v10 }
  0x2e   :  { %v78_v18 = vcombine.high %v70_v15, %v70_v15  ;;  %v106_v20 = vsel %vm105_vm0, %v70_v15, 0.0  ;;  %v95_v26 = vcombine.high %v87_v19, %v87_v19  ;;  %v113_v29 = vsel %vm105_vm0, %v87_v19, 0.0 }
  0x2f   :  { %v79_v21 = vcombine.high %v77_v17, %v77_v17  ;;  %v109_v23 = vsel %vm105_vm0, %v77_v17, 0.0  ;;  %v96_v31 = vcombine.high %v94_v25, %v94_v25  ;;  %v117_v34 = vsel %vm105_vm0, %v94_v25, 0.0 }
  0x30   :  { %v107_v22 = vsel %vm105_vm0, %v78_v18, 0.0  ;;  %v115_v32 = vsel %vm105_vm0, %v95_v26, 0.0 }
  0x31   :  { %v108_v24 = vadd.f32 %v107_v22, %v106_v20  ;;  %v111_v27 = vsel %vm105_vm0, %v79_v21, 0.0  ;;  %v119_v36 = vsel %vm105_vm0, %v96_v31, 0.0 }
  0x33   :  { %v110_v28 = vadd.f32 %v109_v23, %v108_v24 }
  0x35   :  { %v112_v30 = vadd.f32 %v111_v27, %v110_v28 }
  0x37   :  { %v114_v33 = vadd.f32 %v113_v29, %v112_v30 }
  0x39   :  { %v116_v35 = vadd.f32 %v115_v32, %v114_v33 }
  0x3b   :  { %v118_v37 = vadd.f32 %v117_v34, %v116_v35 }
  0x3d   :  { %v120_v38 = vadd.f32 %v119_v36, %v118_v37 }
  0x3f   :  { %121 = vadd.xlane.f32.xlu0 %v120_v38 }
  0xcc   :  { %v122_v39 = vpop.xlane.xlu0 %121 }
  0xcd   :  { %v123_v40 = vrot.slane %v122_v39, 4 }
  0xcf   :  { %v124_v41 = vadd.f32 %v123_v40, %v122_v39 }
  0xd1   :  { %v125_v42 = vrot.slane %v124_v41, 2 }
  0xd3   :  { %v126_v43 = vadd.f32 %v125_v42, %v124_v41 }
  0xd5   :  { %v127_v44 = vrot.slane %v126_v43, 1 }
  0xd7   :  { %v128_v45 = vadd.f32 %v127_v44, %v126_v43 }
  0xd9   :  { %148 = vpush %v128_v45 }
 0x10a   :  { %s149_s1 = spop %148 }
 0x10b   :  { %s130_s4 = smul.f32 0.00048828125, %s149_s1 }
 0x10d   :  { %132 = sst [smem:[#allocation8]] %s130_s4 }
 0x10e   :  { %207 = shalt.err (!%p204_p4)
}
 0x10f   :  { %s217_s12 = smov [#allocation8]  }
 0x110   :  { %140 = dma.smem_to_hbm %s217_s12, 16, %s279_s2, [#allocation5]  }
 0x111   :  { %212 = dma.done.wait [#allocation5], 16  }
 0x112   :  { %213 = vsyncadd [#allocation5], 4294967280 }
 0x113   :  { %144 = sfence }
 0x114   :  { %145 = vsyncpa [#allocation4], 1 }
 0x115   :  { %146 = vsyncpa [#allocation7], 1 }
 0x116   :  { %147 = vsyncpa [#allocation5], 1 }

</bundles_post_ra>
